<compile_context>
chip_gen: v7x
topology: tpu7x:2x2x1
jax: 0.10.0
libtpu: 0.0.40
codegen_flags: <defaults>
</compile_context>

<pallas_src>
import math

import numpy as np
import jax
import jax.numpy as jnp
from jax.experimental import pallas as pl
from jax.experimental.pallas import tpu as pltpu


def peg_kernel(xpad_ref, w_ref, b_ref, o_ref):
    # xpad_ref: [1, H+2, W+2, C] zero-padded image
    # w_ref   : [9, C]  depthwise taps, row = dh*3 + dw
    # b_ref   : [1, C]  bias
    # o_ref   : [1, H, W, C]
    _, H, W, C = o_ref.shape

    # Residual + bias initialize the accumulator (no zeros + extra add).
    acc = xpad_ref[0, 1:1 + H, 1:1 + W, :] + b_ref[...]

    # 9 shifted multiply-accumulates; taps are full-tensor lane-dense VPU ops.
    for dh in range(3):
        for dw in range(3):
            tap = xpad_ref[0, dh:dh + H, dw:dw + W, :]
            wv = w_ref[dh * 3 + dw:dh * 3 + dw + 1, :]          # [1, C]
            acc = acc + tap * wv

    o_ref[0] = acc.astype(o_ref.dtype)


def peg_forward(x, weight, bias, stride=1):
    """x: [B, H, W, C]; weight: [C, 1, 3, 3] (PyTorch depthwise); bias: [C]."""
    assert stride == 1, "only the stride==1 (conv + residual) path is implemented"
    # TODO(synk): stride > 1 path (strided depthwise conv, no residual) not implemented.
    B, H, W, C = x.shape
    assert weight.shape == (C, 1, 3, 3) and bias.shape == (C,)

    # Zero-pad once in the wrapper (cheap XLA pad) so the kernel needs no masks.
    xpad = jnp.pad(x, ((0, 0), (1, 1), (1, 1), (0, 0)))
    # [C,1,3,3] -> [9, C]: one lane-dense [C] tap vector per (dh, dw).
    w_k = jnp.transpose(weight[:, 0], (1, 2, 0)).reshape(9, C)
    b_k = bias.reshape(1, C)

    img_in_spec = pl.BlockSpec((1, H + 2, W + 2, C), lambda b: (b, 0, 0, 0))
    img_out_spec = pl.BlockSpec((1, H, W, C), lambda b: (b, 0, 0, 0))

    return pl.pallas_call(
        peg_kernel,
        out_shape=jax.ShapeDtypeStruct((B, H, W, C), x.dtype),
        grid_spec=pltpu.PrefetchScalarGridSpec(
            num_scalar_prefetch=0,
            grid=(B,),
            in_specs=[
                img_in_spec,
                pl.BlockSpec((9, C), lambda b: (0, 0)),
                pl.BlockSpec((1, C), lambda b: (0, 0)),
            ],
            out_specs=img_out_spec,
        ),
        compiler_params=pltpu.CompilerParams(
            dimension_semantics=("parallel",),
            vmem_limit_bytes=32 << 20,
        ),
    )(xpad, w_k, b_k)


def peg_reference(x, weight, bias):
    """Pure-JAX reference: depthwise 3x3 conv (pad 1) + bias + residual, NHWC."""
    B, H, W, C = x.shape
    xpad = jnp.pad(x, ((0, 0), (1, 1), (1, 1), (0, 0)))
    w = jnp.transpose(weight[:, 0], (1, 2, 0))  # [3, 3, C]
    y = x + bias.reshape(1, 1, 1, C)
    for dh in range(3):
        for dw in range(3):
            y = y + xpad[:, dh:dh + H, dw:dw + W, :] * w[dh, dw]
    return y


if __name__ == "__main__":
    # Small but lane-dense: embed_dim = 128 so C maps exactly onto the 128 lanes.
    B, H, W, C = 2, 16, 16, 128

    key = jax.random.PRNGKey(0)
    kx, kw, kb = jax.random.split(key, 3)

    x = jax.random.normal(kx, (B, H, W, C), jnp.float32)
    # PyTorch Conv2d default init: U(-1/sqrt(fan_in), 1/sqrt(fan_in)), fan_in = 1*3*3.
    bound = 1.0 / math.sqrt(9.0)
    weight = jax.random.uniform(kw, (C, 1, 3, 3), jnp.float32, -bound, bound)
    bias = jax.random.uniform(kb, (C,), jnp.float32, -bound, bound)

    out = jax.block_until_ready(peg_forward(x, weight, bias))
    ref = jax.block_until_ready(peg_reference(x, weight, bias))

    assert out.shape == (B, H, W, C)
    np.testing.assert_allclose(np.asarray(out), np.asarray(ref), atol=1e-5, rtol=1e-5)
    print("KERNEL_OK")
</pallas_src>

<mosaic_0001>
module attributes {stable_mosaic.version = 11 : i64} {
  func.func @peg_kernel(%arg0: i32, %arg1: memref<1x18x18x128xf32, #tpu.memory_space<vmem>>, %arg2: memref<9x128xf32, #tpu.memory_space<vmem>>, %arg3: memref<1x128xf32, #tpu.memory_space<vmem>>, %arg4: memref<1x16x16x128xf32, #tpu.memory_space<vmem>>) attributes {dimension_semantics = [#tpu.dimension_semantics<parallel>], iteration_bounds = array<i64: 2>, scalar_prefetch = 0 : i64, scratch_operands = 0 : i64, tpu.core_type = #tpu.core_type<tc>, window_params = [{transform_indices = @transform_0, window_bounds = array<i64: 1, 18, 18, 128>}, {pipeline_mode = #tpu.pipeline_mode<synchronous>, transform_indices = @transform_1, window_bounds = array<i64: 9, 128>}, {pipeline_mode = #tpu.pipeline_mode<synchronous>, transform_indices = @transform_2, window_bounds = array<i64: 1, 128>}, {transform_indices = @transform_3, window_bounds = array<i64: 1, 16, 16, 128>}]} {
    %c0 = arith.constant 0 : index
    %c1 = arith.constant 1 : index
    %c1_0 = arith.constant 1 : index
    %c0_1 = arith.constant 0 : index
    %0 = vector.load %arg1[%c0, %c1, %c1_0, %c0_1] : memref<1x18x18x128xf32, #tpu.memory_space<vmem>>, vector<1x16x16x128xf32>
    %1 = vector.shape_cast %0 : vector<1x16x16x128xf32> to vector<16x16x128xf32>
    %c0_2 = arith.constant 0 : index
    %c0_3 = arith.constant 0 : index
    %2 = vector.load %arg3[%c0_2, %c0_3] : memref<1x128xf32, #tpu.memory_space<vmem>>, vector<1x128xf32>
    %3 = vector.shape_cast %2 : vector<1x128xf32> to vector<1x1x128xf32>
    %4 = vector.broadcast %3 : vector<1x1x128xf32> to vector<16x16x128xf32>
    %5 = arith.addf %1, %4 : vector<16x16x128xf32>
    %c0_4 = arith.constant 0 : index
    %c0_5 = arith.constant 0 : index
    %c0_6 = arith.constant 0 : index
    %c0_7 = arith.constant 0 : index
    %6 = vector.load %arg1[%c0_4, %c0_5, %c0_6, %c0_7] : memref<1x18x18x128xf32, #tpu.memory_space<vmem>>, vector<1x16x16x128xf32>
    %7 = vector.shape_cast %6 : vector<1x16x16x128xf32> to vector<16x16x128xf32>
    %c0_8 = arith.constant 0 : index
    %c0_9 = arith.constant 0 : index
    %8 = vector.load %arg2[%c0_8, %c0_9] : memref<9x128xf32, #tpu.memory_space<vmem>>, vector<1x128xf32>
    %9 = vector.shape_cast %8 : vector<1x128xf32> to vector<1x1x128xf32>
    %10 = vector.broadcast %9 : vector<1x1x128xf32> to vector<16x16x128xf32>
    %11 = arith.mulf %7, %10 : vector<16x16x128xf32>
    %12 = arith.addf %5, %11 : vector<16x16x128xf32>
    %c0_10 = arith.constant 0 : index
    %c0_11 = arith.constant 0 : index
    %c1_12 = arith.constant 1 : index
    %c0_13 = arith.constant 0 : index
    %13 = vector.load %arg1[%c0_10, %c0_11, %c1_12, %c0_13] : memref<1x18x18x128xf32, #tpu.memory_space<vmem>>, vector<1x16x16x128xf32>
    %14 = vector.shape_cast %13 : vector<1x16x16x128xf32> to vector<16x16x128xf32>
    %c1_14 = arith.constant 1 : index
    %c0_15 = arith.constant 0 : index
    %15 = vector.load %arg2[%c1_14, %c0_15] : memref<9x128xf32, #tpu.memory_space<vmem>>, vector<1x128xf32>
    %16 = vector.shape_cast %15 : vector<1x128xf32> to vector<1x1x128xf32>
    %17 = vector.broadcast %16 : vector<1x1x128xf32> to vector<16x16x128xf32>
    %18 = arith.mulf %14, %17 : vector<16x16x128xf32>
    %19 = arith.addf %12, %18 : vector<16x16x128xf32>
    %c0_16 = arith.constant 0 : index
    %c0_17 = arith.constant 0 : index
    %c2 = arith.constant 2 : index
    %c0_18 = arith.constant 0 : index
    %20 = vector.load %arg1[%c0_16, %c0_17, %c2, %c0_18] : memref<1x18x18x128xf32, #tpu.memory_space<vmem>>, vector<1x16x16x128xf32>
    %21 = vector.shape_cast %20 : vector<1x16x16x128xf32> to vector<16x16x128xf32>
    %c2_19 = arith.constant 2 : index
    %c0_20 = arith.constant 0 : index
    %22 = vector.load %arg2[%c2_19, %c0_20] : memref<9x128xf32, #tpu.memory_space<vmem>>, vector<1x128xf32>
    %23 = vector.shape_cast %22 : vector<1x128xf32> to vector<1x1x128xf32>
    %24 = vector.broadcast %23 : vector<1x1x128xf32> to vector<16x16x128xf32>
    %25 = arith.mulf %21, %24 : vector<16x16x128xf32>
    %26 = arith.addf %19, %25 : vector<16x16x128xf32>
    %c0_21 = arith.constant 0 : index
    %c1_22 = arith.constant 1 : index
    %c0_23 = arith.constant 0 : index
    %c0_24 = arith.constant 0 : index
    %27 = vector.load %arg1[%c0_21, %c1_22, %c0_23, %c0_24] : memref<1x18x18x128xf32, #tpu.memory_space<vmem>>, vector<1x16x16x128xf32>
    %28 = vector.shape_cast %27 : vector<1x16x16x128xf32> to vector<16x16x128xf32>
    %c3 = arith.constant 3 : index
    %c0_25 = arith.constant 0 : index
    %29 = vector.load %arg2[%c3, %c0_25] : memref<9x128xf32, #tpu.memory_space<vmem>>, vector<1x128xf32>
    %30 = vector.shape_cast %29 : vector<1x128xf32> to vector<1x1x128xf32>
    %31 = vector.broadcast %30 : vector<1x1x128xf32> to vector<16x16x128xf32>
    %32 = arith.mulf %28, %31 : vector<16x16x128xf32>
    %33 = arith.addf %26, %32 : vector<16x16x128xf32>
    %c0_26 = arith.constant 0 : index
    %c1_27 = arith.constant 1 : index
    %c1_28 = arith.constant 1 : index
    %c0_29 = arith.constant 0 : index
    %34 = vector.load %arg1[%c0_26, %c1_27, %c1_28, %c0_29] : memref<1x18x18x128xf32, #tpu.memory_space<vmem>>, vector<1x16x16x128xf32>
    %35 = vector.shape_cast %34 : vector<1x16x16x128xf32> to vector<16x16x128xf32>
    %c4 = arith.constant 4 : index
    %c0_30 = arith.constant 0 : index
    %36 = vector.load %arg2[%c4, %c0_30] : memref<9x128xf32, #tpu.memory_space<vmem>>, vector<1x128xf32>
    %37 = vector.shape_cast %36 : vector<1x128xf32> to vector<1x1x128xf32>
    %38 = vector.broadcast %37 : vector<1x1x128xf32> to vector<16x16x128xf32>
    %39 = arith.mulf %35, %38 : vector<16x16x128xf32>
    %40 = arith.addf %33, %39 : vector<16x16x128xf32>
    %c0_31 = arith.constant 0 : index
    %c1_32 = arith.constant 1 : index
    %c2_33 = arith.constant 2 : index
    %c0_34 = arith.constant 0 : index
    %41 = vector.load %arg1[%c0_31, %c1_32, %c2_33, %c0_34] : memref<1x18x18x128xf32, #tpu.memory_space<vmem>>, vector<1x16x16x128xf32>
    %42 = vector.shape_cast %41 : vector<1x16x16x128xf32> to vector<16x16x128xf32>
    %c5 = arith.constant 5 : index
    %c0_35 = arith.constant 0 : index
    %43 = vector.load %arg2[%c5, %c0_35] : memref<9x128xf32, #tpu.memory_space<vmem>>, vector<1x128xf32>
    %44 = vector.shape_cast %43 : vector<1x128xf32> to vector<1x1x128xf32>
    %45 = vector.broadcast %44 : vector<1x1x128xf32> to vector<16x16x128xf32>
    %46 = arith.mulf %42, %45 : vector<16x16x128xf32>
    %47 = arith.addf %40, %46 : vector<16x16x128xf32>
    %c0_36 = arith.constant 0 : index
    %c2_37 = arith.constant 2 : index
    %c0_38 = arith.constant 0 : index
    %c0_39 = arith.constant 0 : index
    %48 = vector.load %arg1[%c0_36, %c2_37, %c0_38, %c0_39] : memref<1x18x18x128xf32, #tpu.memory_space<vmem>>, vector<1x16x16x128xf32>
    %49 = vector.shape_cast %48 : vector<1x16x16x128xf32> to vector<16x16x128xf32>
    %c6 = arith.constant 6 : index
    %c0_40 = arith.constant 0 : index
    %50 = vector.load %arg2[%c6, %c0_40] : memref<9x128xf32, #tpu.memory_space<vmem>>, vector<1x128xf32>
    %51 = vector.shape_cast %50 : vector<1x128xf32> to vector<1x1x128xf32>
    %52 = vector.broadcast %51 : vector<1x1x128xf32> to vector<16x16x128xf32>
    %53 = arith.mulf %49, %52 : vector<16x16x128xf32>
    %54 = arith.addf %47, %53 : vector<16x16x128xf32>
    %c0_41 = arith.constant 0 : index
    %c2_42 = arith.constant 2 : index
    %c1_43 = arith.constant 1 : index
    %c0_44 = arith.constant 0 : index
    %55 = vector.load %arg1[%c0_41, %c2_42, %c1_43, %c0_44] : memref<1x18x18x128xf32, #tpu.memory_space<vmem>>, vector<1x16x16x128xf32>
    %56 = vector.shape_cast %55 : vector<1x16x16x128xf32> to vector<16x16x128xf32>
    %c7 = arith.constant 7 : index
    %c0_45 = arith.constant 0 : index
    %57 = vector.load %arg2[%c7, %c0_45] : memref<9x128xf32, #tpu.memory_space<vmem>>, vector<1x128xf32>
    %58 = vector.shape_cast %57 : vector<1x128xf32> to vector<1x1x128xf32>
    %59 = vector.broadcast %58 : vector<1x1x128xf32> to vector<16x16x128xf32>
    %60 = arith.mulf %56, %59 : vector<16x16x128xf32>
    %61 = arith.addf %54, %60 : vector<16x16x128xf32>
    %c0_46 = arith.constant 0 : index
    %c2_47 = arith.constant 2 : index
    %c2_48 = arith.constant 2 : index
    %c0_49 = arith.constant 0 : index
    %62 = vector.load %arg1[%c0_46, %c2_47, %c2_48, %c0_49] : memref<1x18x18x128xf32, #tpu.memory_space<vmem>>, vector<1x16x16x128xf32>
    %63 = vector.shape_cast %62 : vector<1x16x16x128xf32> to vector<16x16x128xf32>
    %c8 = arith.constant 8 : index
    %c0_50 = arith.constant 0 : index
    %64 = vector.load %arg2[%c8, %c0_50] : memref<9x128xf32, #tpu.memory_space<vmem>>, vector<1x128xf32>
    %65 = vector.shape_cast %64 : vector<1x128xf32> to vector<1x1x128xf32>
    %66 = vector.broadcast %65 : vector<1x1x128xf32> to vector<16x16x128xf32>
    %67 = arith.mulf %63, %66 : vector<16x16x128xf32>
    %68 = arith.addf %61, %67 : vector<16x16x128xf32>
    %c0_51 = arith.constant 0 : index
    %c0_52 = arith.constant 0 : index
    %c0_53 = arith.constant 0 : index
    %c0_54 = arith.constant 0 : index
    %69 = vector.load %arg4[%c0_51, %c0_52, %c0_53, %c0_54] : memref<1x16x16x128xf32, #tpu.memory_space<vmem>>, vector<1x16x16x128xf32>
    %70 = vector.shape_cast %69 : vector<1x16x16x128xf32> to vector<16x16x128xf32>
    %71 = vector.shape_cast %68 : vector<16x16x128xf32> to vector<1x16x16x128xf32>
    tpu.vector_store %arg4[%c0_51, %c0_52, %c0_53, %c0_54], %71 {strides = array<i32>} : memref<1x16x16x128xf32, #tpu.memory_space<vmem>>, vector<1x16x16x128xf32>,
    return
  }
  func.func @transform_0(%arg0: i32) -> (i32, i32, i32, i32) {
    %c0_i32 = arith.constant 0 : i32
    %c0_i32_0 = arith.constant 0 : i32
    %c0_i32_1 = arith.constant 0 : i32
    %c0_i32_2 = arith.constant 0 : i32
    return %arg0, %c0_i32, %c0_i32_0, %c0_i32_1 : i32, i32, i32, i32
  }
  func.func @transform_1(%arg0: i32) -> (i32, i32) {
    %c0_i32 = arith.constant 0 : i32
    %c0_i32_0 = arith.constant 0 : i32
    %c0_i32_1 = arith.constant 0 : i32
    return %c0_i32, %c0_i32_0 : i32, i32
  }
  func.func @transform_2(%arg0: i32) -> (i32, i32) {
    %c0_i32 = arith.constant 0 : i32
    %c0_i32_0 = arith.constant 0 : i32
    %c0_i32_1 = arith.constant 0 : i32
    return %c0_i32, %c0_i32_0 : i32, i32
  }
  func.func @transform_3(%arg0: i32) -> (i32, i32, i32, i32) {
    %c0_i32 = arith.constant 0 : i32
    %c0_i32_0 = arith.constant 0 : i32
    %c0_i32_1 = arith.constant 0 : i32
    %c0_i32_2 = arith.constant 0 : i32
    return %arg0, %c0_i32, %c0_i32_0, %c0_i32_1 : i32, i32, i32, i32
  }
}

</mosaic_0001>

<bundles_post_ra>
// kernel: tpu_custom_call.1
= control target key start
LH: loop header
LB: loop body
LE: loop exit
PB: predicated region body
PF: predicated region fallthrough
CT: control target
= control target key end

     0   :  { %8 = vsyncpa [#allocation3], 0  ;;  %s2415_s0 = inlined_call_operand.vmem [shape: f32[2,18,18,128], index: 0, kind: input, shape index: {}]   ;;  %s2416_s1 = inlined_call_operand.vmem [shape: f32[9,128], index: 1, kind: input, shape index: {}]   ;;  %s2417_s2 = inlined_call_operand.vmem [shape: f32[1,128], index: 2, kind: input, shape index: {}]   ;;  %s2418_s3 = inlined_call_operand.hbm [shape: f32[2,16,16,128], index: 3, kind: output, shape index: {}]  }
   0x1   :  { %10 = vsyncpa [#allocation3 + $0x1], 0  ;;  %s1580_s12 = smov 0   ;;  %s1582_s13 = smov 0  }
   0x2   :  { %s1584_s14 = smov 0   ;;  %s1586_s15 = smov 0  }
   0x3 LB: > { %s1601_s16 = sadd.s32 4294967295, %s1555_s15   ;;  %s1227_s17 = sadd.s32 4294967294, %s1555_s15   ;;  %s1555_s15 = sphi %s1586_s15, %s2424_s15   ;;  %s1551_s14 = sphi %s1584_s14, %s2423_s14   ;;  %s1547_s13 = sphi %s1582_s13, %s2422_s13   ;;  %s1543_s12 = sphi %s1580_s12, %s2421_s12  }
   0x4   : > { %s1605_s18 = sadd.s32 1, %s1555_s15   ;;  %s91_s19 = sadd.s32 1, %s1551_s14 }
   0x5   : > { %s88_s20 = ssub.s32 %s1555_s15, %s1605_s18  ;;  %p101_p0 = scmp.ne.s32.totalorder %s1551_s14, %s1547_s13 }
   0x6   : > { %p89_p1 = scmp.eq.s32.totalorder %s88_s20, 0  ;;  %p102_p2 = scmp.eq.s32.totalorder %s1601_s16, 1 }
   0x7   : > { %p107_p3 = scmp.ne.s32.totalorder %s1547_s13, %s1543_s12  ;;  %p108_p4 = scmp.eq.s32.totalorder %s1227_s17, 1 }
   0x8   : > { %s1616_s21 = scalar_select %p89_p1, %s1551_s14, %s91_s19  }
   0x9   : > { %p1618_p5 = por %p102_p2, %p101_p0  ;;  %p1622_p6 = por %p108_p4, %p107_p3 }
   0xa   : > { %p1230_p7 = scmp.ge.s32.totalorder %s1555_s15, 1  ;;  %p140_p8 = scmp.lt.s32.totalorder %s1555_s15, 3 }
   0xc   : > { %p141_p9 = pnand %p1230_p7, %p140_p8 }
   0xd   : > { %p164_p10 = scmp.lt.s32.totalorder (!%p141_p9), %s1601_s16, 1  ;;  %v1633_v0 = vld [vmem:[%s2417_s2] ss:$0 sm:$0xff] (!%p141_p9)  ;;  %v1643_v2 = vld [vmem:[%s2416_s1 + $0x1] ss:$0 sm:$0xff] (!%p141_p9)  ;;  %s161_s4 = sand.u32 (!%p141_p9), 1, %s1547_s13  }
   0xe   : > { %144 = sbr.rel (%p141_p9) target bundleno = 204 (0xcc), region = 32  ;;  %v1638_v1 = vld [vmem:[%s2416_s1] ss:$0 sm:$0xff] (!%p141_p9)  ;;  %v1648_v3 = vld [vmem:[%s2416_s1 + $0x2] ss:$0 sm:$0xff] (!%p141_p9)  ;;  %s1231_s5 = sshll.u32 (!%p141_p9), %s161_s4, 8 }
   0xf   : > { %v1658_v4 = vld [vmem:[%s2416_s1 + $0x3] ss:$0 sm:$0xff] (!%p141_p9)  ;;  %v1663_v5 = vld [vmem:[%s2416_s1 + $0x4] ss:$0 sm:$0xff] (!%p141_p9)  ;;  %v1668_v6 = vld [vmem:[%s2416_s1 + $0x5] ss:$0 sm:$0xff] (!%p141_p9) }
  0x10   : > { %v1680_v14 = vld [vmem:[%s2416_s1 + $0x6] ss:$0 sm:$0xff] (!%p141_p9)  ;;  %v1685_v15 = vld [vmem:[%s2416_s1 + $0x7] ss:$0 sm:$0xff] (!%p141_p9)  ;;  %v1692_v18 = vld [vmem:[%s2416_s1 + $0x8] ss:$0 sm:$0xff] (!%p141_p9) }
  0x11   : > { %s1793_s6 = scalar_lea.vmem (!%p141_p9), [#allocation2], %s1231_s5  ;;  %s1440_s19 = sshll.u32 (!%p141_p9), %s1601_s16, 12 }
  0x12   : > { %s1165_s20 = sshll.u32 (!%p141_p9), %s1793_s6, 4  ;;  %s2367_s26 = scalar_lea.hbm (!%p141_p9), %s2418_s3, %s1440_s19  ;;  %s2369_s20 = int_to_ptr.vmem [resolvable:$true] %s1165_s20 }
  0x13   : > { %s1493_s27 = scalar_lea.vmem (!%p141_p9), %s2369_s20, 4096 }
  0x14   : > { %p1494_p11 = scmp.ne.s32.totalorder (!%p141_p9), %s2369_s20, %s1493_s27 }
  0x15   : > { %s165_s24 = scalar_select %p164_p10, %s1601_s16, 1 }
  0x16   : > { %p1495_p12 = pnand %p1494_p11, %p1618_p5  ;;  %s1557_s16 = smov [#allocation2]  }
  0x17   : > { %s1441_s25 = smul.u32 432, %s165_s24  ;;  %s1497_s28 = sshll.u32 %s1557_s16, 4  ;;  %s1498_s28 = int_to_ptr.vmem [resolvable:$false] %s1497_s28 }
  0x18   : > { %p1496_p13 = pneg %p1495_p12  ;;  %s1499_s29 = scalar_lea.vmem %s1498_s28, 8192 }
  0x19   : > { %s1653_s9 = scalar_lea.vmem %s2415_s0, %s1441_s25  ;;  %p1500_p0 = scmp.lt.s32.totalorder %s2369_s20, %s1498_s28 }
  0x1a   : > { %v1233_v7 = vld [vmem:[%s1653_s9 + $0x19] sm:$0xff]  ;;  %v342_v9 = vld [vmem:[%s1653_s9 + $0x1] sm:$0xff]  ;;  %v343_v25 = vld [vmem:[%s1653_s9 + $0x9] sm:$0xff]  ;;  %p1501_p1 = scmp.lt.s32.totalorder %s1499_s29, %s1493_s27 }
  0x1b   : > { %v241_v8 = vld [vmem:[%s1653_s9] sm:$0xff]  ;;  %v209_v10 = vadd.f32 %v1633_v0, %v1233_v7  ;;  %v379_v12 = vmul.f32 %v1643_v2, %v342_v9  ;;  %v1269_v16 = vld [vmem:[%s1653_s9 + $0x18] sm:$0xff]  ;;  %v650_v22 = vmul.f32 %v1663_v5, %v1233_v7  ;;  %v242_v24 = vld [vmem:[%s1653_s9 + $0x8] sm:$0xff]  ;;  %v380_v31 = vmul.f32 %v1643_v2, %v343_v25 }
  0x1c   : > { %v278_v11 = vmul.f32 %v1638_v1, %v241_v8  ;;  %v443_v13 = vld [vmem:[%s1653_s9 + $0x2] sm:$0xff]  ;;  %v1303_v17 = vld [vmem:[%s1653_s9 + $0x1a] sm:$0xff]  ;;  %v581_v21 = vmul.f32 %v1658_v4, %v1269_v16  ;;  %v1336_v27 = vld [vmem:[%s1653_s9 + $0x30] sm:$0xff]  ;;  %v279_v30 = vmul.f32 %v1638_v1, %v242_v24  ;;  %v280_v37 = vmul.f32 %v1269_v16, %v1638_v1  ;;  %p1502_p2 = por %p1501_p1, %p1500_p0 }
  0x1d   : > { %v480_v20 = vmul.f32 %v1648_v3, %v443_v13  ;;  %v1234_v23 = vld [vmem:[%s1653_s9 + $0x21] sm:$0xff]  ;;  %v751_v26 = vmul.f32 %v1668_v6, %v1303_v17  ;;  %v1703_v28 = vld [vmem:[%s1653_s9 + $0x31] sm:$0xff]  ;;  %v853_v34 = vmul.f32 %v1680_v14, %v1336_v27  ;;  %v1726_v47 = vld [vmem:[%s1653_s9 + $0x39] sm:$0xff]  ;;  %v381_v49 = vmul.f32 %v1643_v2, %v1233_v7 }
  0x1e   : > { %v310_v19 = vadd.f32 %v278_v11, %v209_v10  ;;  %v210_v29 = vadd.f32 %v1633_v0, %v1234_v23  ;;  %v444_v32 = vld [vmem:[%s1653_s9 + $0xa] sm:$0xff]  ;;  %v954_v35 = vmul.f32 %v1685_v15, %v1703_v28  ;;  %v1402_v36 = vld [vmem:[%s1653_s9 + $0x32] sm:$0xff]  ;;  %v1270_v41 = vld [vmem:[%s1653_s9 + $0x20] sm:$0xff]  ;;  %v651_v42 = vmul.f32 %v1663_v5, %v1234_v23  ;;  %p1503_p3 = pnand %p1502_p2, %p1496_p13 }
  0x1f   : > { %v1715_v38 = vmul.f32 %v1692_v18, %v1402_v36  ;;  %v481_v40 = vmul.f32 %v1648_v3, %v444_v32  ;;  %v582_v44 = vmul.f32 %v1658_v4, %v1270_v41  ;;  %v1304_v45 = vld [vmem:[%s1653_s9 + $0x22] sm:$0xff]  ;;  %v1723_v46 = vld [vmem:[%s1653_s9 + $0x38] sm:$0xff]  ;;  %v211_v48 = vadd.f32 %v1703_v28, %v1633_v0 }
  0x20   : > { %v411_v33 = vadd.f32 %v379_v12, %v310_v19  ;;  %v311_v39 = vadd.f32 %v279_v30, %v210_v29  ;;  %v752_v51 = vmul.f32 %v1668_v6, %v1304_v45  ;;  %v854_v52 = vmul.f32 %v1680_v14, %v1723_v46  ;;  %v1737_v54 = vld [vmem:[%s1653_s9 + $0x3a] sm:$0xff]  ;;  %v1752_v12 = vld [vmem:[%s1653_s9 + $0x48] sm:$0xff] }
  0x21   : > { %v955_v53 = vmul.f32 %v1685_v15, %v1726_v47  ;;  %v1056_v56 = vmul.f32 %v1692_v18, %v1737_v54  ;;  %v312_v57 = vadd.f32 %v280_v37, %v211_v48  ;;  %v482_v58 = vmul.f32 %v1303_v17, %v1648_v3  ;;  %v1755_v13 = vld [vmem:[%s1653_s9 + $0x49] sm:$0xff] }
  0x22   : > { %v512_v43 = vadd.f32 %v480_v20, %v411_v33  ;;  %v412_v50 = vadd.f32 %v380_v31, %v311_v39  ;;  %v583_v60 = vmul.f32 %v1336_v27, %v1658_v4  ;;  %v212_v61 = vadd.f32 %v1726_v47, %v1633_v0 }
  0x23   : > { %v281_v62 = vmul.f32 %v1270_v41, %v1638_v1  ;;  %v413_v7 = vadd.f32 %v381_v49, %v312_v57  ;;  %v652_v8 = vmul.f32 %v1703_v28, %v1663_v5  ;;  %v382_v9 = vmul.f32 %v1643_v2, %v1234_v23  ;;  %v1763_v23 = vld [vmem:[%s1653_s9 + $0x4a] sm:$0xff] }
  0x24   : > { %v613_v55 = vadd.f32 %v581_v21, %v512_v43  ;;  %v513_v59 = vadd.f32 %v481_v40, %v412_v50  ;;  %v753_v11 = vmul.f32 %v1402_v36, %v1668_v6  ;;  %v483_v17 = vmul.f32 %v1304_v45, %v1648_v3 }
  0x25   : > { %v313_v16 = vadd.f32 %v281_v62, %v212_v61  ;;  %v514_v20 = vadd.f32 %v482_v58, %v413_v7  ;;  %v855_v21 = vmul.f32 %v1680_v14, %v1752_v12  ;;  %v1057_v25 = vmul.f32 %v1692_v18, %v1763_v23 }
  0x26   : > { %v682_v63 = vadd.f32 %v650_v22, %v613_v55  ;;  %v614_v10 = vadd.f32 %v582_v44, %v513_v59  ;;  %v956_v22 = vmul.f32 %v1685_v15, %v1755_v13  ;;  %v584_v30 = vmul.f32 %v1723_v46, %v1658_v4  ;;  %v1779_v44 = vld [vmem:[%s1653_s9 + $0x50] sm:$0xff] }
  0x27   : > { %v414_v29 = vadd.f32 %v382_v9, %v313_v16  ;;  %v615_v31 = vadd.f32 %v583_v60, %v514_v20  ;;  %v213_v32 = vadd.f32 %v1755_v13, %v1633_v0  ;;  %v282_v33 = vmul.f32 %v1336_v27, %v1638_v1  ;;  %v1340_v16 = vld [vmem:[%s1653_s9 + $0x60] sm:$0xff] }
  0x28   : > { %v783_v19 = vadd.f32 %v751_v26, %v682_v63  ;;  %v683_v24 = vadd.f32 %v651_v42, %v614_v10  ;;  %v653_v40 = vmul.f32 %v1726_v47, %v1663_v5  ;;  %v383_v41 = vmul.f32 %v1703_v28, %v1643_v2  ;;  %v1405_v10 = vld [vmem:[%s1653_s9 + $0x52] sm:$0xff] }
  0x29   : > { %v515_v39 = vadd.f32 %v483_v17, %v414_v29  ;;  %v684_v43 = vadd.f32 %v652_v8, %v615_v31  ;;  %v484_v45 = vmul.f32 %v1402_v36, %v1648_v3  ;;  %v754_v27 = vmul.f32 %v1737_v54, %v1668_v6  ;;  %v1373_v17 = vld [vmem:[%s1653_s9 + $0x61] sm:$0xff] }
  0x2a   : > { %v885_v26 = vadd.f32 %v853_v34, %v783_v19  ;;  %v784_v37 = vadd.f32 %v752_v51, %v683_v24  ;;  %v314_v34 = vadd.f32 %v282_v33, %v213_v32  ;;  %v856_v50 = vmul.f32 %v1680_v14, %v1779_v44  ;;  %v1372_v51 = vld [vmem:[%s1653_s9 + $0x51] sm:$0xff] }
  0x2b   : > { %v616_v49 = vadd.f32 %v584_v30, %v515_v39  ;;  %v785_v57 = vadd.f32 %v753_v11, %v684_v43  ;;  %v957_v36 = vmul.f32 %v1685_v15, %v1372_v51  ;;  %v214_v61 = vadd.f32 %v1372_v51, %v1633_v0 }
  0x2c   : > { %v986_v42 = vadd.f32 %v954_v35, %v885_v26  ;;  %v886_v48 = vadd.f32 %v854_v52, %v784_v37  ;;  %v415_v28 = vadd.f32 %v383_v41, %v314_v34  ;;  %v585_v35 = vmul.f32 %v1752_v12, %v1658_v4  ;;  %v1374_v37 = vld [vmem:[%s1653_s9 + $0x69] sm:$0xff] }
  0x2d   : > { %v685_v59 = vadd.f32 %v653_v40, %v616_v49  ;;  %v654_v52 = vmul.f32 %v1755_v13, %v1663_v5  ;;  %v755_v7 = vmul.f32 %v1763_v23, %v1668_v6  ;;  %v384_v8 = vmul.f32 %v1726_v47, %v1643_v2  ;;  %v1406_v41 = vld [vmem:[%s1653_s9 + $0x62] sm:$0xff] }
  0x2e   : > { %v1087_v55 = vadd.f32 %v1715_v38, %v986_v42  ;;  %v987_v58 = vadd.f32 %v955_v53, %v886_v48  ;;  %v887_v38 = vadd.f32 %v855_v21, %v785_v57  ;;  %v516_v60 = vadd.f32 %v484_v45, %v415_v28  ;;  %v1341_v49 = vld [vmem:[%s1653_s9 + $0x68] sm:$0xff] }
  0x2f   : > { %v283_v53 = vmul.f32 %v1723_v46, %v1638_v1  ;;  %v786_v63 = vadd.f32 %v754_v27, %v685_v59  ;;  %v485_v20 = vmul.f32 %v1737_v54, %v1648_v3  ;;  %v857_v21 = vmul.f32 %v1680_v14, %v1340_v16 }
  0x30   : > { %1119 = vst [vmem:[%s1793_s6] sm:$0xff] %v1087_v55  ;;  %v1088_v62 = vadd.f32 %v1056_v56, %v987_v58  ;;  %v988_v9 = vadd.f32 %v956_v22, %v887_v38  ;;  %v617_v11 = vadd.f32 %v585_v35, %v516_v60  ;;  %v1058_v56 = vmul.f32 %v1692_v18, %v1405_v10  ;;  %v1375_v60 = vld [vmem:[%s1653_s9 + $0x79] sm:$0xff] }
  0x31   : > { %v315_v19 = vadd.f32 %v283_v53, %v214_v61  ;;  %v888_v46 = vadd.f32 %v856_v50, %v786_v63  ;;  %v586_v29 = vmul.f32 %v1779_v44, %v1658_v4  ;;  %v958_v26 = vmul.f32 %v1685_v15, %v1373_v17 }
  0x32   : > { %1120 = vst [vmem:[%s1793_s6 + $0x8] sm:$0xff] %v1088_v62  ;;  %v1089_v24 = vadd.f32 %v1057_v25, %v988_v9  ;;  %v686_v47 = vadd.f32 %v654_v52, %v617_v11  ;;  %v215_v31 = vadd.f32 %v1373_v17, %v1633_v0  ;;  %v284_v54 = vmul.f32 %v1752_v12, %v1638_v1  ;;  %v1342_v62 = vld [vmem:[%s1653_s9 + $0x78] sm:$0xff] }
  0x33   : > { %v416_v22 = vadd.f32 %v384_v8, %v315_v19  ;;  %v989_v30 = vadd.f32 %v957_v36, %v888_v46  ;;  %v655_v25 = vmul.f32 %v1372_v51, %v1663_v5  ;;  %v385_v39 = vmul.f32 %v1755_v13, %v1643_v2 }
  0x34   : > { %1121 = vst [vmem:[%s1793_s6 + $0x10] sm:$0xff] %v1089_v24  ;;  %v787_v32 = vadd.f32 %v755_v7, %v686_v47  ;;  %v316_v42 = vadd.f32 %v284_v54, %v215_v31  ;;  %v486_v43 = vmul.f32 %v1763_v23, %v1648_v3  ;;  %v1059_v12 = vmul.f32 %v1692_v18, %v1406_v41  ;;  %v1407_v23 = vld [vmem:[%s1653_s9 + $0x6a] sm:$0xff] }
  0x35   : > { %v517_v33 = vadd.f32 %v485_v20, %v416_v22  ;;  %v1090_v40 = vadd.f32 %v1058_v56, %v989_v30  ;;  %v756_v48 = vmul.f32 %v1405_v10, %v1668_v6  ;;  %v858_v27 = vmul.f32 %v1680_v14, %v1341_v49  ;;  %v1408_v22 = vld [vmem:[%s1653_s9 + $0x7a] sm:$0xff] }
  0x36   : > { %v889_v34 = vadd.f32 %v857_v21, %v787_v32  ;;  %v417_v13 = vadd.f32 %v385_v39, %v316_v42  ;;  %v587_v50 = vmul.f32 %v1340_v16, %v1658_v4  ;;  %v216_v55 = vadd.f32 %v1374_v37, %v1633_v0  ;;  %v1853_v30 = vld [vmem:[%s1653_s9 + $0x80] sm:$0xff] }
  0x37   : > { %v618_v45 = vadd.f32 %v586_v29, %v517_v33  ;;  %1122 = vst [vmem:[%s1793_s6 + $0x18] sm:$0xff] %v1090_v40  ;;  %v285_v35 = vmul.f32 %v1779_v44, %v1638_v1  ;;  %v386_v58 = vmul.f32 %v1372_v51, %v1643_v2  ;;  %v959_v59 = vmul.f32 %v1685_v15, %v1374_v37 }
  0x38   : > { %v990_v57 = vadd.f32 %v958_v26, %v889_v34  ;;  %v1060_v36 = vmul.f32 %v1692_v18, %v1407_v23  ;;  %v518_v52 = vadd.f32 %v486_v43, %v417_v13  ;;  %v656_v38 = vmul.f32 %v1373_v17, %v1663_v5  ;;  %v1856_v26 = vld [vmem:[%s1653_s9 + $0x81] sm:$0xff] }
  0x39   : > { %v687_v28 = vadd.f32 %v655_v25, %v618_v45  ;;  %v317_v63 = vadd.f32 %v285_v35, %v216_v55  ;;  %v487_v7 = vmul.f32 %v1405_v10, %v1648_v3  ;;  %v757_v44 = vmul.f32 %v1406_v41, %v1668_v6  ;;  %v1874_v55 = vld [vmem:[%s1653_s9 + $0x91] sm:$0xff] }
  0x3a   : > { %v1091_v61 = vadd.f32 %v1059_v12, %v990_v57  ;;  %v619_v8 = vadd.f32 %v587_v50, %v518_v52  ;;  %v859_v51 = vmul.f32 %v1680_v14, %v1342_v62  ;;  %v588_v9 = vmul.f32 %v1341_v49, %v1658_v4  ;;  %v1344_v35 = vld [vmem:[%s1653_s9 + $0x90] sm:$0xff] }
  0x3b   : > { %v788_v53 = vadd.f32 %v756_v48, %v687_v28  ;;  %v418_v19 = vadd.f32 %v386_v58, %v317_v63  ;;  %v217_v20 = vadd.f32 %v1375_v60, %v1633_v0  ;;  %v286_v46 = vmul.f32 %v1340_v16, %v1638_v1 }
  0x3c   : > { %1123 = vst [vmem:[%s1793_s6 + $0x20] sm:$0xff] %v1091_v61  ;;  %v688_v56 = vadd.f32 %v656_v38, %v619_v8  ;;  %v960_v21 = vmul.f32 %v1685_v15, %v1375_v60  ;;  %v657_v10 = vmul.f32 %v1374_v37, %v1663_v5  ;;  %v387_v24 = vmul.f32 %v1373_v17, %v1643_v2 }
  0x3d   : > { %v890_v11 = vadd.f32 %v858_v27, %v788_v53  ;;  %v519_v29 = vadd.f32 %v487_v7, %v418_v19  ;;  %v318_v31 = vadd.f32 %v286_v46, %v217_v20  ;;  %v488_v54 = vmul.f32 %v1406_v41, %v1648_v3  ;;  %v1409_v27 = vld [vmem:[%s1653_s9 + $0x82] sm:$0xff]  ;;  %v1378_v46 = vld [vmem:[%s1653_s9 + $0x99] sm:$0xff] }
  0x3e   : > { %v789_v16 = vadd.f32 %v757_v44, %v688_v56  ;;  %v1061_v32 = vmul.f32 %v1692_v18, %v1408_v22  ;;  %v758_v33 = vmul.f32 %v1407_v23, %v1668_v6  ;;  %v860_v17 = vmul.f32 %v1680_v14, %v1853_v30  ;;  %v1410_v44 = vld [vmem:[%s1653_s9 + $0x92] sm:$0xff] }
  0x3f   : > { %v991_v47 = vadd.f32 %v959_v59, %v890_v11  ;;  %v620_v39 = vadd.f32 %v588_v9, %v519_v29  ;;  %v419_v40 = vadd.f32 %v387_v24, %v318_v31  ;;  %v589_v42 = vmul.f32 %v1342_v62, %v1658_v4 }
  0x40   : > { %v891_v43 = vadd.f32 %v859_v51, %v789_v16  ;;  %v218_v41 = vadd.f32 %v1856_v26, %v1633_v0  ;;  %v287_v34 = vmul.f32 %v1341_v49, %v1638_v1  ;;  %v388_v12 = vmul.f32 %v1374_v37, %v1643_v2 }
  0x41   : > { %v1092_v25 = vadd.f32 %v1060_v36, %v991_v47  ;;  %v689_v45 = vadd.f32 %v657_v10, %v620_v39  ;;  %v961_v48 = vmul.f32 %v1685_v15, %v1856_v26  ;;  %v520_v13 = vadd.f32 %v488_v54, %v419_v40  ;;  %v1345_v10 = vld [vmem:[%s1653_s9 + $0x98] sm:$0xff] }
  0x42   : > { %v658_v50 = vmul.f32 %v1375_v60, %v1663_v5  ;;  %v992_v57 = vadd.f32 %v960_v21, %v891_v43  ;;  %v1062_v28 = vmul.f32 %v1692_v18, %v1409_v27  ;;  %v319_v49 = vadd.f32 %v287_v34, %v218_v41  ;;  %v1411_v39 = vld [vmem:[%s1653_s9 + $0x9a] sm:$0xff] }
  0x43   : > { %1124 = vst [vmem:[%s1793_s6 + $0x28] sm:$0xff] %v1092_v25  ;;  %v489_v37 = vmul.f32 %v1407_v23, %v1648_v3  ;;  %v790_v58 = vadd.f32 %v758_v33, %v689_v45  ;;  %v621_v59 = vadd.f32 %v589_v42, %v520_v13  ;;  %v759_v36 = vmul.f32 %v1408_v22, %v1668_v6  ;;  %v1346_v13 = vld [vmem:[%s1653_s9 + $0xa8] sm:$0xff] }
  0x44   : > { %v861_v52 = vmul.f32 %v1680_v14, %v1344_v35  ;;  %v1093_v38 = vadd.f32 %v1061_v32, %v992_v57  ;;  %v420_v61 = vadd.f32 %v388_v12, %v319_v49  ;;  %v590_v53 = vmul.f32 %v1853_v30, %v1658_v4  ;;  %v1379_v12 = vld [vmem:[%s1653_s9 + $0xa9] sm:$0xff] }
  0x45   : > { %v219_v63 = vadd.f32 %v1874_v55, %v1633_v0  ;;  %v892_v7 = vadd.f32 %v860_v17, %v790_v58  ;;  %v690_v8 = vadd.f32 %v658_v50, %v621_v59  ;;  %v288_v23 = vmul.f32 %v1342_v62, %v1638_v1 }
  0x46   : > { %v389_v51 = vmul.f32 %v1375_v60, %v1643_v2  ;;  %1125 = vst [vmem:[%s1793_s6 + $0x30] sm:$0xff] %v1093_v38  ;;  %v962_v9 = vmul.f32 %v1685_v15, %v1874_v55  ;;  %v1063_v11 = vmul.f32 %v1692_v18, %v1410_v44  ;;  %v521_v19 = vadd.f32 %v489_v37, %v420_v61 }
  0x47   : > { %v659_v20 = vmul.f32 %v1856_v26, %v1663_v5  ;;  %v993_v56 = vadd.f32 %v961_v48, %v892_v7  ;;  %v791_v21 = vadd.f32 %v759_v36, %v690_v8  ;;  %v320_v24 = vadd.f32 %v288_v23, %v219_v63  ;;  %v1412_v63 = vld [vmem:[%s1653_s9 + $0xaa] sm:$0xff] }
  0x48   : > { %v490_v62 = vmul.f32 %v1408_v22, %v1648_v3  ;;  %v622_v60 = vadd.f32 %v590_v53, %v521_v19  ;;  %v760_v47 = vmul.f32 %v1409_v27, %v1668_v6  ;;  %v862_v29 = vmul.f32 %v1680_v14, %v1345_v10  ;;  %v1926_v8 = vld [vmem:[%s1653_s9 + $0xb0] sm:$0xff] }
  0x49   : > { %v591_v31 = vmul.f32 %v1344_v35, %v1658_v4  ;;  %v1094_v54 = vadd.f32 %v1062_v28, %v993_v56  ;;  %v893_v16 = vadd.f32 %v861_v52, %v791_v21  ;;  %v421_v32 = vadd.f32 %v389_v51, %v320_v24  ;;  %v1929_v23 = vld [vmem:[%s1653_s9 + $0xb1] sm:$0xff] }
  0x4a   : > { %v220_v33 = vadd.f32 %v1378_v46, %v1633_v0  ;;  %v691_v17 = vadd.f32 %v659_v20, %v622_v60  ;;  %v963_v25 = vmul.f32 %v1685_v15, %v1378_v46  ;;  %v289_v22 = vmul.f32 %v1853_v30, %v1638_v1 }
  0x4b   : > { %v390_v40 = vmul.f32 %v1856_v26, %v1643_v2  ;;  %1126 = vst [vmem:[%s1793_s6 + $0x38] sm:$0xff] %v1094_v54  ;;  %v994_v42 = vadd.f32 %v962_v9, %v893_v16  ;;  %v1064_v43 = vmul.f32 %v1692_v18, %v1411_v39  ;;  %v522_v41 = vadd.f32 %v490_v62, %v421_v32  ;;  %v1413_v54 = vld [vmem:[%s1653_s9 + $0xb2] sm:$0xff] }
  0x4c   : > { %v660_v34 = vmul.f32 %v1874_v55, %v1663_v5  ;;  %v792_v45 = vadd.f32 %v760_v47, %v691_v17  ;;  %v761_v48 = vmul.f32 %v1410_v44, %v1668_v6  ;;  %v321_v50 = vadd.f32 %v289_v22, %v220_v33  ;;  %v1947_v33 = vld [vmem:[%s1653_s9 + $0xc1] sm:$0xff] }
  0x4d   : > { %v491_v30 = vmul.f32 %v1409_v27, %v1648_v3  ;;  %v1095_v57 = vadd.f32 %v1063_v11, %v994_v42  ;;  %v623_v26 = vadd.f32 %v591_v31, %v522_v41  ;;  %v863_v28 = vmul.f32 %v1680_v14, %v1346_v13  ;;  %v1348_v22 = vld [vmem:[%s1653_s9 + $0xc0] sm:$0xff] }
  0x4e   : > { %v592_v49 = vmul.f32 %v1345_v10, %v1658_v4  ;;  %v894_v37 = vadd.f32 %v862_v29, %v792_v45  ;;  %v422_v58 = vadd.f32 %v390_v40, %v321_v50  ;;  %v221_v59 = vadd.f32 %v1379_v12, %v1633_v0 }
  0x4f   : > { %v290_v36 = vmul.f32 %v1344_v35, %v1638_v1  ;;  %1127 = vst [vmem:[%s1793_s6 + $0x40] sm:$0xff] %v1095_v57  ;;  %v692_v52 = vadd.f32 %v660_v34, %v623_v26  ;;  %v964_v38 = vmul.f32 %v1685_v15, %v1379_v12  ;;  %v661_v27 = vmul.f32 %v1378_v46, %v1663_v5  ;;  %v1414_v26 = vld [vmem:[%s1653_s9 + $0xc2] sm:$0xff] }
  0x50   : > { %v391_v61 = vmul.f32 %v1874_v55, %v1643_v2  ;;  %v995_v53 = vadd.f32 %v963_v25, %v894_v37  ;;  %v523_v7 = vadd.f32 %v491_v30, %v422_v58  ;;  %v492_v35 = vmul.f32 %v1410_v44, %v1648_v3 }
  0x51   : > { %v322_v51 = vadd.f32 %v290_v36, %v221_v59  ;;  %v793_v9 = vadd.f32 %v761_v48, %v692_v52  ;;  %v1065_v11 = vmul.f32 %v1692_v18, %v1412_v63  ;;  %v762_v19 = vmul.f32 %v1411_v39, %v1668_v6  ;;  %v1382_v36 = vld [vmem:[%s1653_s9 + $0xc9] sm:$0xff] }
  0x52   : > { %v864_v55 = vmul.f32 %v1680_v14, %v1926_v8  ;;  %v1096_v20 = vadd.f32 %v1064_v43, %v995_v53  ;;  %v624_v56 = vadd.f32 %v592_v49, %v523_v7  ;;  %v593_v24 = vmul.f32 %v1346_v13, %v1658_v4 }
  0x53   : > { %v423_v21 = vadd.f32 %v391_v61, %v322_v51  ;;  %v895_v62 = vadd.f32 %v863_v28, %v793_v9  ;;  %v222_v44 = vadd.f32 %v1929_v23, %v1633_v0  ;;  %v291_v60 = vmul.f32 %v1345_v10, %v1638_v1 }
  0x54   : > { %v392_v47 = vmul.f32 %v1378_v46, %v1643_v2  ;;  %1128 = vst [vmem:[%s1793_s6 + $0x48] sm:$0xff] %v1096_v20  ;;  %v693_v29 = vadd.f32 %v661_v27, %v624_v56  ;;  %v965_v31 = vmul.f32 %v1685_v15, %v1929_v23  ;;  %v662_v32 = vmul.f32 %v1379_v12, %v1663_v5  ;;  %v1349_v27 = vld [vmem:[%s1653_s9 + $0xc8] sm:$0xff] }
  0x55   : > { %v524_v16 = vadd.f32 %v492_v35, %v423_v21  ;;  %v996_v17 = vadd.f32 %v964_v38, %v895_v62  ;;  %v1066_v25 = vmul.f32 %v1692_v18, %v1413_v54  ;;  %v323_v10 = vadd.f32 %v291_v60, %v222_v44  ;;  %v1415_v56 = vld [vmem:[%s1653_s9 + $0xca] sm:$0xff] }
  0x56   : > { %v493_v46 = vmul.f32 %v1411_v39, %v1648_v3  ;;  %v794_v40 = vadd.f32 %v762_v19, %v693_v29  ;;  %v763_v43 = vmul.f32 %v1412_v63, %v1668_v6  ;;  %v865_v41 = vmul.f32 %v1680_v14, %v1348_v22 }
  0x57   : > { %v625_v42 = vadd.f32 %v593_v24, %v524_v16  ;;  %v1097_v34 = vadd.f32 %v1065_v11, %v996_v17  ;;  %v424_v45 = vadd.f32 %v392_v47, %v323_v10  ;;  %v594_v48 = vmul.f32 %v1926_v8, %v1658_v4  ;;  %v1383_v47 = vld [vmem:[%s1653_s9 + $0xd9] sm:$0xff] }
  0x58   : > { %v223_v50 = vadd.f32 %v1947_v33, %v1633_v0  ;;  %v896_v30 = vadd.f32 %v864_v55, %v794_v40  ;;  %v292_v39 = vmul.f32 %v1346_v13, %v1638_v1  ;;  %v393_v28 = vmul.f32 %v1379_v12, %v1643_v2  ;;  %v1350_v16 = vld [vmem:[%s1653_s9 + $0xd8] sm:$0xff] }
  0x59   : > { %v694_v57 = vadd.f32 %v662_v32, %v625_v42  ;;  %1129 = vst [vmem:[%s1793_s6 + $0x50] sm:$0xff] %v1097_v34  ;;  %v966_v49 = vmul.f32 %v1685_v15, %v1947_v33  ;;  %v1067_v37 = vmul.f32 %v1692_v18, %v1414_v26  ;;  %v525_v58 = vadd.f32 %v493_v46, %v424_v45 }
  0x5a   : > { %v663_v59 = vmul.f32 %v1929_v23, %v1663_v5  ;;  %v997_v52 = vadd.f32 %v965_v31, %v896_v30  ;;  %v324_v61 = vadd.f32 %v292_v39, %v223_v50  ;;  %v494_v13 = vmul.f32 %v1412_v63, %v1648_v3  ;;  %v1416_v50 = vld [vmem:[%s1653_s9 + $0xda] sm:$0xff] }
  0x5b   : > { %v795_v38 = vadd.f32 %v763_v43, %v694_v57  ;;  %v626_v12 = vadd.f32 %v594_v48, %v525_v58  ;;  %v764_v53 = vmul.f32 %v1413_v54, %v1668_v6  ;;  %v866_v7 = vmul.f32 %v1680_v14, %v1349_v27  ;;  %v1999_v57 = vld [vmem:[%s1653_s9 + $0xe0] sm:$0xff] }
  0x5c   : > { %v595_v51 = vmul.f32 %v1348_v22, %v1658_v4  ;;  %v1098_v35 = vadd.f32 %v1066_v25, %v997_v52  ;;  %v425_v11 = vadd.f32 %v393_v28, %v324_v61  ;;  %v224_v19 = vadd.f32 %v1382_v36, %v1633_v0  ;;  %v2002_v39 = vld [vmem:[%s1653_s9 + $0xe1] sm:$0xff] }
  0x5d   : > { %v897_v9 = vadd.f32 %v865_v41, %v795_v38  ;;  %v695_v55 = vadd.f32 %v663_v59, %v626_v12  ;;  %v967_v20 = vmul.f32 %v1685_v15, %v1382_v36  ;;  %v293_v63 = vmul.f32 %v1926_v8, %v1638_v1 }
  0x5e   : > { %v394_v21 = vmul.f32 %v1929_v23, %v1643_v2  ;;  %1130 = vst [vmem:[%s1793_s6 + $0x58] sm:$0xff] %v1098_v35  ;;  %v1068_v62 = vmul.f32 %v1692_v18, %v1415_v56  ;;  %v526_v44 = vadd.f32 %v494_v13, %v425_v11  ;;  %v664_v60 = vmul.f32 %v1947_v33, %v1663_v5  ;;  %v1417_v35 = vld [vmem:[%s1653_s9 + $0xe2] sm:$0xff] }
  0x5f   : > { %v998_v24 = vadd.f32 %v966_v49, %v897_v9  ;;  %v796_v29 = vadd.f32 %v764_v53, %v695_v55  ;;  %v765_v31 = vmul.f32 %v1414_v26, %v1668_v6  ;;  %v325_v32 = vadd.f32 %v293_v63, %v224_v19  ;;  %v2020_v19 = vld [vmem:[%s1653_s9 + $0xf1] sm:$0xff] }
  0x60   : > { %v495_v8 = vmul.f32 %v1413_v54, %v1648_v3  ;;  %v627_v23 = vadd.f32 %v595_v51, %v526_v44  ;;  %v867_v25 = vmul.f32 %v1680_v14, %v1350_v16  ;;  %v596_v10 = vmul.f32 %v1349_v27, %v1658_v4  ;;  %v1352_v63 = vld [vmem:[%s1653_s9 + $0xf0] sm:$0xff] }
  0x61   : > { %v1099_v17 = vadd.f32 %v1067_v37, %v998_v24  ;;  %v898_v46 = vadd.f32 %v866_v7, %v796_v29  ;;  %v426_v40 = vadd.f32 %v394_v21, %v325_v32  ;;  %v225_v42 = vadd.f32 %v1383_v47, %v1633_v0 }
  0x62   : > { %v294_v43 = vmul.f32 %v1348_v22, %v1638_v1  ;;  %v696_v41 = vadd.f32 %v664_v60, %v627_v23  ;;  %v968_v34 = vmul.f32 %v1685_v15, %v1383_v47  ;;  %v665_v54 = vmul.f32 %v1382_v36, %v1663_v5  ;;  %v1418_v23 = vld [vmem:[%s1653_s9 + $0xf2] sm:$0xff] }
  0x63   : > { %1131 = vst [vmem:[%s1793_s6 + $0x60] sm:$0xff] %v1099_v17  ;;  %v395_v45 = vmul.f32 %v1947_v33, %v1643_v2  ;;  %v999_v48 = vadd.f32 %v967_v20, %v898_v46  ;;  %v527_v30 = vadd.f32 %v495_v8, %v426_v40  ;;  %v496_v22 = vmul.f32 %v1414_v26, %v1648_v3 }
  0x64   : > { %v326_v28 = vadd.f32 %v294_v43, %v225_v42  ;;  %v797_v49 = vadd.f32 %v765_v31, %v696_v41  ;;  %v1069_v37 = vmul.f32 %v1692_v18, %v1416_v50  ;;  %v766_v58 = vmul.f32 %v1415_v56, %v1668_v6  ;;  %v1386_v43 = vld [vmem:[%s1653_s9 + $0xf9] sm:$0xff] }
  0x65   : > { %v868_v33 = vmul.f32 %v1680_v14, %v1999_v57  ;;  %v1100_v59 = vadd.f32 %v1068_v62, %v999_v48  ;;  %v628_v52 = vadd.f32 %v596_v10, %v527_v30  ;;  %v597_v61 = vmul.f32 %v1350_v16, %v1658_v4 }
  0x66   : > { %v427_v38 = vadd.f32 %v395_v45, %v326_v28  ;;  %v899_v13 = vadd.f32 %v867_v25, %v797_v49  ;;  %v226_v26 = vadd.f32 %v2002_v39, %v1633_v0  ;;  %v295_v12 = vmul.f32 %v1349_v27, %v1638_v1 }
  0x67   : > { %v396_v53 = vmul.f32 %v1382_v36, %v1643_v2  ;;  %1132 = vst [vmem:[%s1793_s6 + $0x68] sm:$0xff] %v1100_v59  ;;  %v697_v7 = vadd.f32 %v665_v54, %v628_v52  ;;  %v969_v51 = vmul.f32 %v1685_v15, %v2002_v39  ;;  %v666_v11 = vmul.f32 %v1383_v47, %v1663_v5  ;;  %v1353_v54 = vld [vmem:[%s1653_s9 + $0xf8] sm:$0xff] }
  0x68   : > { %v528_v9 = vadd.f32 %v496_v22, %v427_v38  ;;  %v1000_v55 = vadd.f32 %v968_v34, %v899_v13  ;;  %v1070_v20 = vmul.f32 %v1692_v18, %v1417_v35  ;;  %v327_v27 = vadd.f32 %v295_v12, %v226_v26  ;;  %v1419_v52 = vld [vmem:[%s1653_s9 + $0xfa] sm:$0xff] }
  0x69   : > { %v497_v36 = vmul.f32 %v1415_v56, %v1648_v3  ;;  %v798_v21 = vadd.f32 %v766_v58, %v697_v7  ;;  %v767_v62 = vmul.f32 %v1416_v50, %v1668_v6  ;;  %v869_v44 = vmul.f32 %v1680_v14, %v1352_v63 }
  0x6a   : > { %v629_v24 = vadd.f32 %v597_v61, %v528_v9  ;;  %v1101_v60 = vadd.f32 %v1069_v37, %v1000_v55  ;;  %v428_v29 = vadd.f32 %v396_v53, %v327_v27  ;;  %v598_v31 = vmul.f32 %v1999_v57, %v1658_v4  ;;  %v1387_v53 = vld [vmem:[%s1653_s9 + $0x109] sm:$0xff] }
  0x6b   : > { %v227_v32 = vadd.f32 %v2020_v19, %v1633_v0  ;;  %v900_v8 = vadd.f32 %v868_v33, %v798_v21  ;;  %v296_v56 = vmul.f32 %v1350_v16, %v1638_v1  ;;  %v397_v25 = vmul.f32 %v1383_v47, %v1643_v2  ;;  %v1354_v9 = vld [vmem:[%s1653_s9 + $0x108] sm:$0xff] }
  0x6c   : > { %v698_v17 = vadd.f32 %v666_v11, %v629_v24  ;;  %1133 = vst [vmem:[%s1793_s6 + $0x70] sm:$0xff] %v1101_v60  ;;  %v970_v10 = vmul.f32 %v1685_v15, %v2020_v19  ;;  %v1071_v46 = vmul.f32 %v1692_v18, %v1418_v23  ;;  %v529_v40 = vadd.f32 %v497_v36, %v428_v29 }
  0x6d   : > { %v667_v42 = vmul.f32 %v2002_v39, %v1663_v5  ;;  %v1001_v41 = vadd.f32 %v969_v51, %v900_v8  ;;  %v328_v45 = vadd.f32 %v296_v56, %v227_v32  ;;  %v498_v16 = vmul.f32 %v1416_v50, %v1648_v3  ;;  %v1420_v32 = vld [vmem:[%s1653_s9 + $0x10a] sm:$0xff] }
  0x6e   : > { %v799_v34 = vadd.f32 %v767_v62, %v698_v17  ;;  %v630_v47 = vadd.f32 %v598_v31, %v529_v40  ;;  %v768_v48 = vmul.f32 %v1417_v35, %v1668_v6  ;;  %v870_v30 = vmul.f32 %v1680_v14, %v1353_v54  ;;  %v2072_v17 = vld [vmem:[%s1653_s9 + $0x110] sm:$0xff] }
  0x6f   : > { %v599_v28 = vmul.f32 %v1352_v63, %v1658_v4  ;;  %v1102_v22 = vadd.f32 %v1070_v20, %v1001_v41  ;;  %v429_v37 = vadd.f32 %v397_v25, %v328_v45  ;;  %v228_v58 = vadd.f32 %v1386_v43, %v1633_v0  ;;  %v2075_v56 = vld [vmem:[%s1653_s9 + $0x111] sm:$0xff] }
  0x70   : > { %v901_v49 = vadd.f32 %v869_v44, %v799_v34  ;;  %v699_v33 = vadd.f32 %v667_v42, %v630_v47  ;;  %v971_v59 = vmul.f32 %v1685_v15, %v1386_v43  ;;  %v297_v50 = vmul.f32 %v1999_v57, %v1638_v1 }
  0x71   : > { %v398_v38 = vmul.f32 %v2002_v39, %v1643_v2  ;;  %1134 = vst [vmem:[%s1793_s6 + $0x78] sm:$0xff] %v1102_v22  ;;  %v1072_v13 = vmul.f32 %v1692_v18, %v1419_v52  ;;  %v530_v26 = vadd.f32 %v498_v16, %v429_v37  ;;  %v668_v12 = vmul.f32 %v2020_v19, %v1663_v5  ;;  %v2091_v22 = vld [vmem:[%s1653_s9 + $0x112] sm:$0xff] }
  0x72   : > { %v1002_v61 = vadd.f32 %v970_v10, %v901_v49  ;;  %v800_v7 = vadd.f32 %v768_v48, %v699_v33  ;;  %v769_v51 = vmul.f32 %v1418_v23, %v1668_v6  ;;  %v329_v11 = vadd.f32 %v297_v50, %v228_v58  ;;  %v2095_v58 = vld [vmem:[%s1653_s9 + $0x121] sm:$0xff] }
  0x73   : > { %v499_v57 = vmul.f32 %v1417_v35, %v1648_v3  ;;  %v631_v39 = vadd.f32 %v599_v28, %v530_v26  ;;  %v871_v20 = vmul.f32 %v1680_v14, %v1354_v9  ;;  %v600_v27 = vmul.f32 %v1353_v54, %v1658_v4 }
  0x74   : > { %v1103_v55 = vadd.f32 %v1071_v46, %v1002_v61  ;;  %v902_v36 = vadd.f32 %v870_v30, %v800_v7  ;;  %v430_v21 = vadd.f32 %v398_v38, %v329_v11  ;;  %v229_v24 = vadd.f32 %v1387_v53, %v1633_v0 }
  0x75   : > { %v298_v62 = vmul.f32 %v1352_v63, %v1638_v1  ;;  %v700_v44 = vadd.f32 %v668_v12, %v631_v39  ;;  %v972_v60 = vmul.f32 %v1685_v15, %v1387_v53  ;;  %v669_v35 = vmul.f32 %v1386_v43, %v1663_v5 }
  0x76   : > { %1135 = vst [vmem:[%s1793_s6 + $0x80] sm:$0xff] %v1103_v55  ;;  %v399_v29 = vmul.f32 %v2020_v19, %v1643_v2  ;;  %v1003_v31 = vadd.f32 %v971_v59, %v902_v36  ;;  %v531_v8 = vadd.f32 %v499_v57, %v430_v21  ;;  %v500_v63 = vmul.f32 %v1418_v23, %v1648_v3 }
  0x77   : > { %v330_v25 = vadd.f32 %v298_v62, %v229_v24  ;;  %v801_v10 = vadd.f32 %v769_v51, %v700_v44  ;;  %v1073_v46 = vmul.f32 %v1692_v18, %v1420_v32  ;;  %v770_v40 = vmul.f32 %v1419_v52, %v1668_v6  ;;  %v2126_v24 = vld [vmem:[%s1653_s9 + $0x128] sm:$0xff]  ;;  %v2146_v62 = vld [vmem:[%s2416_s1 + $0x3] ss:$0 sm:$0xff] }
  0x78   : > { %v872_v19 = vmul.f32 %v1680_v14, %v2072_v17  ;;  %v1104_v42 = vadd.f32 %v1072_v13, %v1003_v31  ;;  %v632_v41 = vadd.f32 %v600_v27, %v531_v8  ;;  %v601_v45 = vmul.f32 %v1354_v9, %v1658_v4  ;;  %v2153_v31 = vld [vmem:[%s2417_s2] ss:$0 sm:$0xff]  ;;  %v2160_v8 = vld [vmem:[%s2416_s1 + $0x7] ss:$0 sm:$0xff] }
  0x79   : > { %v431_v34 = vadd.f32 %v399_v29, %v330_v25  ;;  %v903_v16 = vadd.f32 %v871_v20, %v801_v10  ;;  %v230_v23 = vadd.f32 %v2075_v56, %v1633_v0  ;;  %v299_v47 = vmul.f32 %v1353_v54, %v1638_v1  ;;  %v2100_v54 = vld [vmem:[%s1653_s9 + $0x120] sm:$0xff] }
  0x7a   : > { %v400_v48 = vmul.f32 %v1386_v43, %v1643_v2  ;;  %1136 = vst [vmem:[%s1793_s6 + $0x88] sm:$0xff] %v1104_v42  ;;  %v701_v30 = vadd.f32 %v669_v35, %v632_v41  ;;  %v973_v28 = vmul.f32 %v1685_v15, %v2075_v56  ;;  %v670_v37 = vmul.f32 %v1387_v53, %v1663_v5  ;;  %v2168_v10 = vld [vmem:[%s2416_s1] ss:$0 sm:$0xff]  ;;  %v2183_v41 = vld [vmem:[%s2416_s1 + $0x8] ss:$0 sm:$0xff] }
  0x7b   : > { %v532_v49 = vadd.f32 %v500_v63, %v431_v34  ;;  %v1004_v33 = vadd.f32 %v972_v60, %v903_v16  ;;  %v1074_v59 = vmul.f32 %v1692_v18, %v2091_v22  ;;  %v331_v43 = vadd.f32 %v299_v47, %v230_v23  ;;  %v1423_v63 = vld [vmem:[%s1653_s9 + $0x12a] sm:$0xff] }
  0x7c   : > { %v501_v50 = vmul.f32 %v1419_v52, %v1648_v3  ;;  %v802_v38 = vadd.f32 %v770_v40, %v701_v30  ;;  %v771_v13 = vmul.f32 %v1420_v32, %v1668_v6  ;;  %v873_v26 = vmul.f32 %v1680_v14, %v2100_v54  ;;  %v2111_v3 = vld [vmem:[%s1653_s9 + $0x122] sm:$0xff]  ;;  %v2175_v40 = vld [vmem:[%s2416_s1 + $0x1] ss:$0 sm:$0xff] }
  0x7d   : > { %v633_v61 = vadd.f32 %v601_v45, %v532_v49  ;;  %v1105_v12 = vadd.f32 %v1073_v46, %v1004_v33  ;;  %v432_v7 = vadd.f32 %v400_v48, %v331_v43  ;;  %v602_v51 = vmul.f32 %v2072_v17, %v1658_v4  ;;  %v1358_v48 = vld [vmem:[%s1653_s9 + $0x138] sm:$0xff]  ;;  %v2204_v33 = vld [vmem:[%s2416_s1 + $0x6] ss:$0 sm:$0xff] }
  0x7e   : > { %v231_v11 = vadd.f32 %v2095_v58, %v1633_v0  ;;  %v904_v57 = vadd.f32 %v872_v19, %v802_v38  ;;  %v300_v52 = vmul.f32 %v1354_v9, %v1638_v1  ;;  %v401_v6 = vmul.f32 %v1387_v53, %v1643_v2  ;;  %v2123_v0 = vld [vmem:[%s1653_s9 + $0x129] sm:$0xff]  ;;  %v2131_v2 = vld [vmem:[%s2416_s1 + $0x2] ss:$0 sm:$0xff] }
  0x7f   : > { %v702_v55 = vadd.f32 %v670_v37, %v633_v61  ;;  %1137 = vst [vmem:[%s1793_s6 + $0x90] sm:$0xff] %v1105_v12  ;;  %v974_v39 = vmul.f32 %v1685_v15, %v2095_v58  ;;  %v1075_v20 = vmul.f32 %v1692_v18, %v2111_v3  ;;  %v533_v27 = vadd.f32 %v501_v50, %v432_v7 }
  0x80   : > { %v671_v4 = vmul.f32 %v2075_v56, %v1663_v5  ;;  %v1005_v36 = vadd.f32 %v973_v28, %v904_v57  ;;  %v332_v1 = vadd.f32 %v300_v52, %v231_v11  ;;  %v502_v15 = vmul.f32 %v2131_v2, %v1420_v32  ;;  %v2137_v5 = vld [vmem:[%s2416_s1 + $0x5] ss:$0 sm:$0xff]  ;;  %v1424_v11 = vld [vmem:[%s1653_s9 + $0x13a] sm:$0xff] }
  0x81   : > { %v803_v21 = vadd.f32 %v771_v13, %v702_v55  ;;  %v634_v18 = vadd.f32 %v602_v51, %v533_v27  ;;  %v772_v53 = vmul.f32 %v2137_v5, %v2091_v22  ;;  %v874_v9 = vmul.f32 %v1680_v14, %v2126_v24  ;;  %v2222_v55 = vld [vmem:[%s1653_s9 + $0x140] sm:$0xff] }
  0x82   : > { %v603_v44 = vmul.f32 %v2146_v62, %v2100_v54  ;;  %v1106_v60 = vadd.f32 %v1074_v59, %v1005_v36  ;;  %v433_v29 = vadd.f32 %v401_v6, %v332_v1  ;;  %v232_v14 = vadd.f32 %v2153_v31, %v2123_v0  ;;  %v2225_v52 = vld [vmem:[%s1653_s9 + $0x141] sm:$0xff] }
  0x83   : > { %v905_v35 = vadd.f32 %v873_v26, %v803_v21  ;;  %v703_v32 = vadd.f32 %v671_v4, %v634_v18  ;;  %v975_v25 = vmul.f32 %v2160_v8, %v2123_v0  ;;  %v301_v46 = vmul.f32 %v2168_v10, %v2072_v17  ;;  %v2189_v17 = vld [vmem:[%s2416_s1 + $0x4] ss:$0 sm:$0xff] }
  0x84   : > { %v402_v19 = vmul.f32 %v2175_v40, %v2075_v56  ;;  %1138 = vst [vmem:[%s1793_s6 + $0x98] sm:$0xff] %v1106_v60  ;;  %v1076_v34 = vmul.f32 %v2183_v41, %v1423_v63  ;;  %v534_v45 = vadd.f32 %v502_v15, %v433_v29  ;;  %v672_v16 = vmul.f32 %v2189_v17, %v2095_v58  ;;  %v2194_v56 = vld [vmem:[%s1653_s9 + $0x139] sm:$0xff]  ;;  %v1425_v60 = vld [vmem:[%s1653_s9 + $0x142] sm:$0xff] }
  0x85   : > { %v1006_v42 = vadd.f32 %v974_v39, %v905_v35  ;;  %v804_v23 = vadd.f32 %v772_v53, %v703_v32  ;;  %v773_v47 = vmul.f32 %v2137_v5, %v2111_v3  ;;  %v333_v30 = vadd.f32 %v301_v46, %v232_v14  ;;  %v2247_v14 = vld [vmem:[%s1653_s9 + $0x151] sm:$0xff] }
  0x86   : > { %v503_v28 = vmul.f32 %v2131_v2, %v2091_v22  ;;  %v635_v37 = vadd.f32 %v603_v44, %v534_v45  ;;  %v875_v59 = vmul.f32 %v2204_v33, %v1358_v48  ;;  %v604_v43 = vmul.f32 %v2146_v62, %v2126_v24 }
  0x87   : > { %v1107_v49 = vadd.f32 %v1075_v20, %v1006_v42  ;;  %v906_v50 = vadd.f32 %v874_v9, %v804_v23  ;;  %v434_v38 = vadd.f32 %v402_v19, %v333_v30  ;;  %v233_v22 = vadd.f32 %v2153_v31, %v2194_v56 }
  0x88   : > { %v302_v61 = vmul.f32 %v2168_v10, %v2100_v54  ;;  %v704_v13 = vadd.f32 %v672_v16, %v635_v37  ;;  %v976_v26 = vmul.f32 %v2160_v8, %v2194_v56  ;;  %v673_v12 = vmul.f32 %v2189_v17, %v2123_v0  ;;  %v1426_v37 = vld [vmem:[%s1653_s9 + $0x152] sm:$0xff] }
  0x89   : > { %1139 = vst [vmem:[%s1793_s6 + $0xa0] sm:$0xff] %v1107_v49  ;;  %v403_v7 = vmul.f32 %v2175_v40, %v2095_v58  ;;  %v1007_v51 = vadd.f32 %v975_v25, %v906_v50  ;;  %v535_v57 = vadd.f32 %v503_v28, %v434_v38  ;;  %v504_v6 = vmul.f32 %v2131_v2, %v2111_v3 }
  0x8a   : > { %v334_v54 = vadd.f32 %v302_v61, %v233_v22  ;;  %v805_v39 = vadd.f32 %v773_v47, %v704_v13  ;;  %v1077_v20 = vmul.f32 %v2183_v41, %v1424_v11  ;;  %v774_v27 = vmul.f32 %v2137_v5, %v1423_v63  ;;  %v1394_v61 = vld [vmem:[%s1653_s9 + $0x159] sm:$0xff] }
  0x8b   : > { %v876_v58 = vmul.f32 %v2204_v33, %v2222_v55  ;;  %v1108_v4 = vadd.f32 %v1076_v34, %v1007_v51  ;;  %v636_v36 = vadd.f32 %v604_v43, %v535_v57  ;;  %v605_v1 = vmul.f32 %v2146_v62, %v1358_v48 }
  0x8c   : > { %v435_v21 = vadd.f32 %v403_v7, %v334_v54  ;;  %v907_v15 = vadd.f32 %v875_v59, %v805_v39  ;;  %v234_v3 = vadd.f32 %v2153_v31, %v2225_v52  ;;  %v303_v18 = vmul.f32 %v2168_v10, %v2126_v24  ;;  %v1360_v24 = vld [vmem:[%s1653_s9 + $0x150] sm:$0xff] }
  0x8d   : > { %v404_v53 = vmul.f32 %v2175_v40, %v2123_v0  ;;  %1140 = vst [vmem:[%s1793_s6 + $0xa8] sm:$0xff] %v1108_v4  ;;  %v705_v9 = vadd.f32 %v673_v12, %v636_v36  ;;  %v977_v44 = vmul.f32 %v2160_v8, %v2225_v52  ;;  %v674_v29 = vmul.f32 %v2189_v17, %v2194_v56  ;;  %v1361_v12 = vld [vmem:[%s1653_s9 + $0x158] sm:$0xff] }
  0x8e   : > { %v536_v35 = vadd.f32 %v504_v6, %v435_v21  ;;  %v1008_v32 = vadd.f32 %v976_v26, %v907_v15  ;;  %v1078_v25 = vmul.f32 %v2183_v41, %v1425_v60  ;;  %v335_v46 = vadd.f32 %v303_v18, %v234_v3  ;;  %v1427_v36 = vld [vmem:[%s1653_s9 + $0x15a] sm:$0xff] }
  0x8f   : > { %v505_v0 = vmul.f32 %v2131_v2, %v1423_v63  ;;  %v806_v19 = vadd.f32 %v774_v27, %v705_v9  ;;  %v775_v34 = vmul.f32 %v2137_v5, %v1424_v11  ;;  %v877_v45 = vmul.f32 %v2204_v33, %v1360_v24 }
  0x90   : > { %v637_v42 = vadd.f32 %v605_v1, %v536_v35  ;;  %v1109_v16 = vadd.f32 %v1077_v20, %v1008_v32  ;;  %v436_v23 = vadd.f32 %v404_v53, %v335_v46  ;;  %v606_v47 = vmul.f32 %v2146_v62, %v2222_v55  ;;  %v1395_v53 = vld [vmem:[%s1653_s9 + $0x169] sm:$0xff] }
  0x91   : > { %v235_v30 = vadd.f32 %v2153_v31, %v2247_v14  ;;  %v908_v28 = vadd.f32 %v876_v58, %v806_v19  ;;  %v304_v63 = vmul.f32 %v2168_v10, %v1358_v48  ;;  %v405_v59 = vmul.f32 %v2175_v40, %v2194_v56  ;;  %v1362_v35 = vld [vmem:[%s1653_s9 + $0x168] sm:$0xff] }
  0x92   : > { %v706_v49 = vadd.f32 %v674_v29, %v637_v42  ;;  %1141 = vst [vmem:[%s1793_s6 + $0xb0] sm:$0xff] %v1109_v16  ;;  %v978_v43 = vmul.f32 %v2160_v8, %v2247_v14  ;;  %v1079_v50 = vmul.f32 %v2183_v41, %v1426_v37  ;;  %v537_v38 = vadd.f32 %v505_v0, %v436_v23 }
  0x93   : > { %v675_v22 = vmul.f32 %v2189_v17, %v2225_v52  ;;  %v1009_v13 = vadd.f32 %v977_v44, %v908_v28  ;;  %v336_v48 = vadd.f32 %v304_v63, %v235_v30  ;;  %v506_v7 = vmul.f32 %v2131_v2, %v1424_v11  ;;  %v1428_v30 = vld [vmem:[%s1653_s9 + $0x16a] sm:$0xff] }
  0x94   : > { %v807_v26 = vadd.f32 %v775_v34, %v706_v49  ;;  %v638_v56 = vadd.f32 %v606_v47, %v537_v38  ;;  %v776_v51 = vmul.f32 %v2137_v5, %v1425_v60  ;;  %v878_v57 = vmul.f32 %v2204_v33, %v1361_v12  ;;  %v1363_v49 = vld [vmem:[%s1653_s9 + $0x170] sm:$0xff] }
  0x95   : > { %v607_v54 = vmul.f32 %v2146_v62, %v1360_v24  ;;  %v1110_v6 = vadd.f32 %v1078_v25, %v1009_v13  ;;  %v437_v20 = vadd.f32 %v405_v59, %v336_v48  ;;  %v236_v27 = vadd.f32 %v2153_v31, %v1394_v61  ;;  %v1396_v63 = vld [vmem:[%s1653_s9 + $0x171] sm:$0xff] }
  0x96   : > { %v909_v39 = vadd.f32 %v877_v45, %v807_v26  ;;  %v707_v58 = vadd.f32 %v675_v22, %v638_v56  ;;  %v979_v4 = vmul.f32 %v2160_v8, %v1394_v61  ;;  %v305_v11 = vmul.f32 %v2168_v10, %v2222_v55 }
  0x97   : > { %v406_v21 = vmul.f32 %v2175_v40, %v2225_v52  ;;  %1142 = vst [vmem:[%s1793_s6 + $0xb8] sm:$0xff] %v1110_v6  ;;  %v1080_v15 = vmul.f32 %v2183_v41, %v1427_v36  ;;  %v538_v3 = vadd.f32 %v506_v7, %v437_v20  ;;  %v676_v18 = vmul.f32 %v2189_v17, %v2247_v14  ;;  %v1429_v6 = vld [vmem:[%s1653_s9 + $0x172] sm:$0xff] }
  0x98   : > { %v1010_v1 = vadd.f32 %v978_v43, %v909_v39  ;;  %v808_v9 = vadd.f32 %v776_v51, %v707_v58  ;;  %v777_v44 = vmul.f32 %v2137_v5, %v1426_v37  ;;  %v337_v29 = vadd.f32 %v305_v11, %v236_v27  ;;  %v1397_v27 = vld [vmem:[%s1653_s9 + $0x181] sm:$0xff] }
  0x99   : > { %v507_v55 = vmul.f32 %v2131_v2, %v1425_v60  ;;  %v639_v52 = vadd.f32 %v607_v54, %v538_v3  ;;  %v879_v25 = vmul.f32 %v2204_v33, %v1362_v35  ;;  %v608_v46 = vmul.f32 %v2146_v62, %v1361_v12  ;;  %v1364_v11 = vld [vmem:[%s1653_s9 + $0x180] sm:$0xff] }
  0x9a   : > { %v1111_v32 = vadd.f32 %v1079_v50, %v1010_v1  ;;  %v910_v0 = vadd.f32 %v878_v57, %v808_v9  ;;  %v438_v19 = vadd.f32 %v406_v21, %v337_v29  ;;  %v237_v42 = vadd.f32 %v2153_v31, %v1395_v53 }
  0x9b   : > { %v306_v34 = vmul.f32 %v2168_v10, %v1360_v24  ;;  %v708_v45 = vadd.f32 %v676_v18, %v639_v52  ;;  %v980_v16 = vmul.f32 %v2160_v8, %v1395_v53  ;;  %v677_v60 = vmul.f32 %v2189_v17, %v1394_v61 }
  0x9c   : > { %1143 = vst [vmem:[%s1793_s6 + $0xc0] sm:$0xff] %v1111_v32  ;;  %v407_v23 = vmul.f32 %v2175_v40, %v2247_v14  ;;  %v1011_v47 = vadd.f32 %v979_v4, %v910_v0  ;;  %v539_v28 = vadd.f32 %v507_v55, %v438_v19  ;;  %v508_v43 = vmul.f32 %v2131_v2, %v1426_v37  ;;  %v1398_v19 = vld [vmem:[%s1653_s9 + $0x189] sm:$0xff] }
  0x9d   : > { %v338_v59 = vadd.f32 %v306_v34, %v237_v42  ;;  %v809_v24 = vadd.f32 %v777_v44, %v708_v45  ;;  %v1081_v50 = vmul.f32 %v2183_v41, %v1428_v30  ;;  %v778_v38 = vmul.f32 %v2137_v5, %v1427_v36  ;;  %v1430_v45 = vld [vmem:[%s1653_s9 + $0x182] sm:$0xff] }
  0x9e   : > { %v880_v22 = vmul.f32 %v2204_v33, %v1363_v49  ;;  %v1112_v13 = vadd.f32 %v1080_v15, %v1011_v47  ;;  %v640_v14 = vadd.f32 %v608_v46, %v539_v28  ;;  %v609_v48 = vmul.f32 %v2146_v62, %v1362_v35 }
  0x9f   : > { %v439_v26 = vadd.f32 %v407_v23, %v338_v59  ;;  %v911_v7 = vadd.f32 %v879_v25, %v809_v24  ;;  %v238_v56 = vadd.f32 %v2153_v31, %v1396_v63  ;;  %v307_v37 = vmul.f32 %v2168_v10, %v1361_v12 }
  0xa0   : > { %v408_v51 = vmul.f32 %v2175_v40, %v1394_v61  ;;  %1144 = vst [vmem:[%s1793_s6 + $0xc8] sm:$0xff] %v1112_v13  ;;  %v709_v57 = vadd.f32 %v677_v60, %v640_v14  ;;  %v981_v54 = vmul.f32 %v2160_v8, %v1396_v63  ;;  %v678_v20 = vmul.f32 %v2189_v17, %v1395_v53 }
  0xa1   : > { %v540_v39 = vadd.f32 %v508_v43, %v439_v26  ;;  %v1012_v58 = vadd.f32 %v980_v16, %v911_v7  ;;  %v1082_v4 = vmul.f32 %v2183_v41, %v1429_v6  ;;  %v339_v21 = vadd.f32 %v307_v37, %v238_v56  ;;  %v1365_v43 = vld [vmem:[%s1653_s9 + $0x188] sm:$0xff]  ;;  %v1366_v37 = vld [vmem:[%s1653_s9 + $0x198] sm:$0xff] }
  0xa2   : > { %v509_v1 = vmul.f32 %v2131_v2, %v1427_v36  ;;  %v810_v12 = vadd.f32 %v778_v38, %v709_v57  ;;  %v779_v15 = vmul.f32 %v2137_v5, %v1428_v30  ;;  %v881_v3 = vmul.f32 %v2204_v33, %v1364_v11 }
  0xa3   : > { %v641_v61 = vadd.f32 %v609_v48, %v540_v39  ;;  %v1113_v18 = vadd.f32 %v1081_v50, %v1012_v58  ;;  %v440_v9 = vadd.f32 %v408_v51, %v339_v21  ;;  %v610_v44 = vmul.f32 %v2146_v62, %v1363_v49  ;;  %v1399_v39 = vld [vmem:[%s1653_s9 + $0x199] sm:$0xff] }
  0xa4   : > { %v239_v29 = vadd.f32 %v2153_v31, %v1397_v27  ;;  %v912_v55 = vadd.f32 %v880_v22, %v810_v12  ;;  %v308_v52 = vmul.f32 %v2168_v10, %v1362_v35  ;;  %v409_v36 = vmul.f32 %v2175_v40, %v1395_v53 }
  0xa5   : > { %v710_v32 = vadd.f32 %v678_v20, %v641_v61  ;;  %1145 = vst [vmem:[%s1793_s6 + $0xd0] sm:$0xff] %v1113_v18  ;;  %v982_v25 = vmul.f32 %v2160_v8, %v1397_v27  ;;  %v541_v46 = vadd.f32 %v509_v1, %v440_v9  ;;  %v679_v0 = vmul.f32 %v2189_v17, %v1396_v63  ;;  %v1367_v61 = vld [vmem:[%s1653_s9 + $0x1a0] sm:$0xff] }
  0xa6   : > { %v1013_v42 = vadd.f32 %v981_v54, %v912_v55  ;;  %v340_v16 = vadd.f32 %v308_v52, %v239_v29  ;;  %v510_v60 = vmul.f32 %v2131_v2, %v1428_v30  ;;  %v1083_v23 = vmul.f32 %v2183_v41, %v1430_v45  ;;  %v1431_v54 = vld [vmem:[%s1653_s9 + $0x18a] sm:$0xff] }
  0xa7   : > { %v811_v34 = vadd.f32 %v779_v15, %v710_v32  ;;  %v642_v35 = vadd.f32 %v610_v44, %v541_v46  ;;  %v780_v53 = vmul.f32 %v2137_v5, %v1429_v6  ;;  %v611_v47 = vmul.f32 %v2146_v62, %v1364_v11  ;;  %v1400_v44 = vld [vmem:[%s1653_s9 + $0x1a1] sm:$0xff] }
  0xa8   : > { %v1114_v28 = vadd.f32 %v1082_v4, %v1013_v42  ;;  %v441_v24 = vadd.f32 %v409_v36, %v340_v16  ;;  %v240_v50 = vadd.f32 %v2153_v31, %v1398_v19  ;;  %v882_v22 = vmul.f32 %v2204_v33, %v1365_v43  ;;  %v1433_v32 = vld [vmem:[%s1653_s9 + $0x1a2] sm:$0xff] }
  0xa9   : > { %v913_v59 = vadd.f32 %v881_v3, %v811_v34  ;;  %v711_v38 = vadd.f32 %v679_v0, %v642_v35  ;;  %v309_v30 = vmul.f32 %v2168_v10, %v1363_v49  ;;  %v410_v13 = vmul.f32 %v2175_v40, %v1396_v63 }
  0xaa   : > { %1146 = vst [vmem:[%s1793_s6 + $0xd8] sm:$0xff] %v1114_v28  ;;  %v542_v26 = vadd.f32 %v510_v60, %v441_v24  ;;  %v680_v48 = vmul.f32 %v2189_v17, %v1397_v27  ;;  %v983_v56 = vmul.f32 %v2160_v8, %v1398_v19  ;;  %v511_v51 = vmul.f32 %v2131_v2, %v1429_v6  ;;  %v1432_v6 = vld [vmem:[%s1653_s9 + $0x19a] sm:$0xff]  ;;  %s2374_s9 = scalar_lea.sflag [#allocation3], %s161_s4 }
  0xab   : > { %v1014_v14 = vadd.f32 %v982_v25, %v913_v59  ;;  %v812_v7 = vadd.f32 %v780_v53, %v711_v38  ;;  %v341_v31 = vadd.f32 %v309_v30, %v240_v50  ;;  %v781_v40 = vmul.f32 %v2137_v5, %v1430_v45 }
  0xac   : > { %v643_v10 = vadd.f32 %v611_v47, %v542_v26  ;;  %v1084_v63 = vmul.f32 %v2183_v41, %v1431_v54  ;;  %v612_v27 = vmul.f32 %v2146_v62, %v1365_v43  ;;  %v883_v4 = vmul.f32 %v2204_v33, %v1366_v37 }
  0xad   : > { %v1115_v57 = vadd.f32 %v1083_v23, %v1014_v14  ;;  %v914_v49 = vadd.f32 %v882_v22, %v812_v7  ;;  %v442_v20 = vadd.f32 %v410_v13, %v341_v31  ;;  %v681_v21 = vmul.f32 %v2189_v17, %v1398_v19 }
  0xae   : > { %v712_v58 = vadd.f32 %v680_v48, %v643_v10  ;;  %v984_v12 = vmul.f32 %v2160_v8, %v1399_v39  ;;  %v782_v62 = vmul.f32 %v2137_v5, %v1431_v54  ;;  %v1085_v9 = vmul.f32 %v2183_v41, %v1432_v6 }
  0xaf   : > { %1147 = vst [vmem:[%s1793_s6 + $0xe0] sm:$0xff] %v1115_v57  ;;  %v1015_v2 = vadd.f32 %v983_v56, %v914_v49  ;;  %v543_v11 = vadd.f32 %v511_v51, %v442_v20  ;;  %v884_v17 = vmul.f32 %v2204_v33, %v1367_v61  ;;  %v985_v36 = vmul.f32 %v2160_v8, %v1400_v44 }
  0xb0   : > { %v813_v1 = vadd.f32 %v781_v40, %v712_v58  ;;  %v1086_v5 = vmul.f32 %v2183_v41, %v1433_v32 }
  0xb1   : > { %v1116_v15 = vadd.f32 %v1084_v63, %v1015_v2  ;;  %v644_v3 = vadd.f32 %v612_v27, %v543_v11 }
  0xb2   : > { %v915_v18 = vadd.f32 %v883_v4, %v813_v1 }
  0xb3   : > { %1148 = vst [vmem:[%s1793_s6 + $0xe8] sm:$0xff] %v1116_v15  ;;  %v713_v29 = vadd.f32 %v681_v21, %v644_v3 }
  0xb4   : > { %v1016_v55 = vadd.f32 %v984_v12, %v915_v18 }
  0xb5   : > { %v814_v52 = vadd.f32 %v782_v62, %v713_v29 }
  0xb6   : > { %v1117_v25 = vadd.f32 %v1085_v9, %v1016_v55 }
  0xb7   : > { %v916_v46 = vadd.f32 %v884_v17, %v814_v52 }
  0xb8   : > { %1149 = vst [vmem:[%s1793_s6 + $0xf0] sm:$0xff] %v1117_v25 }
  0xb9   : > { %v1017_v0 = vadd.f32 %v985_v36, %v916_v46 }
  0xbb   : > { %v1118_v33 = vadd.f32 %v1086_v5, %v1017_v0 }
  0xbd   : > { %1150 = vst [vmem:[%s1793_s6 + $0xf8] sm:$0xff] %v1118_v33 }
  0xbe   : > { %1506 = shalt.err (!%p1503_p3)
}
  0xbf   : > { %s1507_s4 = scalar_lea.hbm %s2367_s26, 4096  ;;  %s1511_s5 = scalar_lea.hbm %s2418_s3, 8192 }
  0xc0   : > { %p1508_p4 = scmp.ne.s32.totalorder %s2367_s26, %s1507_s4  ;;  %p1512_p9 = scmp.lt.u32.totalorder %s2367_s26, %s2418_s3 }
  0xc1   : > { %p1513_p10 = scmp.lt.u32.totalorder %s1511_s5, %s1507_s4  ;;  %p1515_p12 = scmp.lt.u32.totalorder %s1507_s4, %s2367_s26 }
  0xc2   : > { %p1509_p7 = pnand %p1508_p4, %p1618_p5 }
  0xc3   : > { %p1514_p11 = por %p1513_p10, %p1512_p9 }
  0xc4   : > { %p1510_p8 = pneg %p1509_p7 }
  0xc5   : > { %p1516_p13 = por %p1515_p12, %p1514_p11 }
  0xc7   : > { %p1517_p0 = pnand %p1516_p13, %p1510_p8 }
  0xc9   : > { %1520 = shalt.err (!%p1517_p0)
}
  0xca   : > { %s1558_s10 = smov 128   ;;  %s1559_s11 = smov 8  }
  0xcb   : > { %1442 = dma.vmem_to_hbm [thread:$0]  (%p1618_p5), %s2369_s20, 4096, %s2367_s26, %s2374_s9, %s1558_s10, %s1558_s10, %s1559_s11  }
  0xcc PF: > { %p1448_p1 = scmp.ge.s32.totalorder %s1555_s15, 2  ;;  %s1180_s17 = sand.u32 1, %s1543_s12  }
  0xcd   : > { %s1181_s19 = scalar_lea.sflag [#allocation3], %s1180_s17 }
  0xce   : > { %p1445_p2 = pnand %p1448_p1, %p1622_p6 }
  0xd0   : > { %1538 = dma.done.wait (!%p1445_p2), %s1181_s19, 4096  }
  0xd1   : > { %1540 = vsyncadd (!%p1445_p2), %s1181_s19, 4294963200  ;;  %p13_p3 = scmp.ge.s32.totalorder %s1605_s18, 4   ;;  %s2421_s12 = smov %s1547_s13 }
  0xd2   : > { %s2422_s13 = smov %s1551_s14  ;;  %s2423_s14 = smov %s1616_s21 }
  0xd3   : > { %s2424_s15 = smov %s1605_s18  ;;  %15 = sbr.rel (!%p13_p3) target bundleno = 3 (0x3), region = 69 }
  0xda   :  { %1186 = vsyncpa [#allocation3], 1 }
  0xdb   :  { %1188 = vsyncpa [#allocation3 + $0x1], 1 }

</bundles_post_ra>
